<compile_context>
chip_gen: v5e
topology: v5e:2x2
jax: 0.10.0
libtpu: 0.0.40
codegen_flags: <defaults>
</compile_context>

<pallas_src>
import functools

import jax
import jax.numpy as jnp
from jax.experimental import pallas as pl
from jax.experimental.pallas import tpu as pltpu

LANE = 128            # final logits stored lane-dense at this width
SUBLANE = 8           # f32 sublane granule
HIDDEN_PAD = 16       # bf16 sublane-pack granule; hidden widths rounded to this
MAX_BATCH_TILE = 256  # cap batch tile so (TB, D) f32 activations stay vreg-resident


def _round_up(n, m):
    return ((n + m - 1) // m) * m


# --------------------------------------------------------------------------- #
# Fused kernel: all hidden layers + classifier in one body.
# --------------------------------------------------------------------------- #
def _dense_cell_kernel(*refs, num_layers):
    # refs = (x, w0, s0, w1, s1, ..., wc, bc, out); weights bf16, shifts/bias f32.
    x_ref = refs[0]
    o_ref = refs[-1]

    h = x_ref[...]                                   # f32 (TB, in_w)
    idx = 1
    for _ in range(num_layers):
        w_ref, s_ref = refs[idx], refs[idx + 1]
        idx += 2
        # bf16 MXU operands, f32 accumulation; bias+BN shift and ReLU in f32.
        z = jnp.dot(h.astype(jnp.bfloat16), w_ref[...],
                    preferred_element_type=jnp.float32)
        h = jnp.maximum(z + s_ref[...], 0.0)

    wc_ref, bc_ref = refs[idx], refs[idx + 1]
    logits = jnp.dot(h.astype(jnp.bfloat16), wc_ref[...],
                     preferred_element_type=jnp.float32) + bc_ref[...]
    o_ref[...] = logits.astype(o_ref.dtype)          # lane-dense (TB, 128) store


def _fused_forward(x_pad, flat_params, num_layers, out_pad, tb):
    """Single pallas_call, batch-tiled grid, weights resident across tiles."""
    B, in_w = x_pad.shape
    inputs = [x_pad] + list(flat_params)
    kernel = functools.partial(_dense_cell_kernel, num_layers=num_layers)

    in_specs = [pl.BlockSpec((tb, in_w), lambda i: (i, 0))]
    in_specs += [pl.BlockSpec(p.shape, lambda i: (0, 0)) for p in flat_params]

    flops = 2 * B * sum(int(w.shape[0]) * int(w.shape[1])
                        for w in flat_params[0::2])
    bytes_accessed = (int(x_pad.size) * x_pad.dtype.itemsize
                      + sum(int(p.size) * p.dtype.itemsize for p in flat_params)
                      + B * out_pad * 4)

    return pl.pallas_call(
        kernel,
        out_shape=jax.ShapeDtypeStruct((B, out_pad), jnp.float32),
        grid=(B // tb,),
        in_specs=in_specs,
        out_specs=pl.BlockSpec((tb, out_pad), lambda i: (i, 0)),
        compiler_params=pltpu.CompilerParams(
            dimension_semantics=("parallel",)),
        cost_estimate=pl.CostEstimate(flops=flops, transcendentals=0,
                                      bytes_accessed=bytes_accessed),
    )(*inputs)


# --------------------------------------------------------------------------- #
# Parameter init (PyTorch-equivalent layout) and one-time prep (fold + pad).
# --------------------------------------------------------------------------- #
def init_dense_cell_params(key, layer_dims, num_classes=2):
    """layer_dims = [(in0, out0), (in1, out1), ...] like maps[i].size()."""
    params = {"layers": [], "classifier": {}}
    eps = 1e-5
    for (din, dout) in layer_dims:
        key, k_w, k_b, k_g, k_be, k_m, k_v = jax.random.split(key, 7)
        bound = 1.0 / jnp.sqrt(din)
        w = jax.random.uniform(k_w, (dout, din), jnp.float32, -bound, bound)
        b = jax.random.uniform(k_b, (dout,), jnp.float32, -bound, bound)
        # Randomized BN state so the folding path is actually exercised.
        gamma = jax.random.uniform(k_g, (dout,), jnp.float32, 0.5, 1.5)
        beta = jax.random.uniform(k_be, (dout,), jnp.float32, -0.5, 0.5)
        running_mean = jax.random.uniform(k_m, (dout,), jnp.float32, -0.5, 0.5)
        running_var = jax.random.uniform(k_v, (dout,), jnp.float32, 0.5, 1.5)
        params["layers"].append(
            dict(w=w, b=b, gamma=gamma, beta=beta,
                 running_mean=running_mean, running_var=running_var, eps=eps)
        )
    din = layer_dims[-1][1]
    key, k_w, k_b = jax.random.split(key, 3)
    bound = 1.0 / jnp.sqrt(din)
    params["classifier"]["w"] = jax.random.uniform(
        k_w, (num_classes, din), jnp.float32, -bound, bound)
    params["classifier"]["b"] = jax.random.uniform(
        k_b, (num_classes,), jnp.float32, -bound, bound)
    return params


def prepare_fused_params(params):
    """One-time prep: fold BN (in f32), pre-transpose, minimally pad, cast to bf16.

    Hidden widths padded to 16 (bf16 pack granule) only; the classifier's lane dim
    is padded to 128 so the final store is lane-dense.  Padded rows/cols and shifts
    are zero, so padding cannot contaminate real outputs through ReLU.
    """
    flat = []
    in_dim = int(params["layers"][0]["w"].shape[1])
    cur_w = _round_up(in_dim, SUBLANE)               # padded width of current input
    in_dim_pad = cur_w

    for lp in params["layers"]:
        scale = lp["gamma"] / jnp.sqrt(lp["running_var"] + lp["eps"])        # (Dout,)
        shift = (lp["b"] - lp["running_mean"]) * scale + lp["beta"]          # (Dout,)
        w_folded = lp["w"].T * scale[None, :]                                # (Din, Dout) f32
        din, dout = w_folded.shape
        out_w = _round_up(dout, HIDDEN_PAD)
        w_pad = jnp.zeros((cur_w, out_w), jnp.float32).at[:din, :dout].set(w_folded)
        s_pad = jnp.zeros((1, out_w), jnp.float32).at[:, :dout].set(shift[None, :])
        flat += [w_pad.astype(jnp.bfloat16), s_pad]  # fold in f32, store weights bf16
        cur_w = out_w

    wc = params["classifier"]["w"].T                                         # (Din, C)
    bc = params["classifier"]["b"]
    din, nc = wc.shape
    out_pad = _round_up(nc, LANE)
    wc_pad = jnp.zeros((cur_w, out_pad), jnp.float32).at[:din, :nc].set(wc)
    bc_pad = jnp.zeros((1, out_pad), jnp.float32).at[:, :nc].set(bc[None, :])
    flat += [wc_pad.astype(jnp.bfloat16), bc_pad]

    return {
        "flat": flat,                              # [w0,s0, w1,s1, ..., wc,bc]
        "num_layers": len(params["layers"]),
        "in_dim": in_dim,
        "in_dim_pad": in_dim_pad,
        "num_classes": int(nc),
        "out_pad": int(out_pad),
    }


def dense_cell_forward(prepped, x):
    """Forward pass of DenseCell (eval mode). x: [B, F_in] float32 -> [B, C] logits."""
    B, din = x.shape
    assert din == prepped["in_dim"]
    in_w = prepped["in_dim_pad"]

    # Batch tile: whole batch if small, else 256-row tiles (keeps activations in vregs).
    tb = min(_round_up(B, SUBLANE), MAX_BATCH_TILE)
    b_pad = _round_up(B, tb)

    # Only copy/pad x if strictly needed (no copy at all for aligned shapes).
    if (b_pad, in_w) != (B, din):
        x_in = jnp.zeros((b_pad, in_w), jnp.float32).at[:B, :din].set(x)
    else:
        x_in = x

    out = _fused_forward(x_in, prepped["flat"], prepped["num_layers"],
                         prepped["out_pad"], tb)
    # NOTE: downstream consumers that accept padded (B_pad, 128) logits can skip this.
    return out[:B, :prepped["num_classes"]]


def dense_cell_reference(params, x):
    """Pure-JAX f32 reference (eval-mode BN with running stats)."""
    h = x
    for lp in params["layers"]:
        z = h @ lp["w"].T + lp["b"]
        z = (z - lp["running_mean"]) / jnp.sqrt(lp["running_var"] + lp["eps"]) \
            * lp["gamma"] + lp["beta"]
        h = jnp.maximum(z, 0.0)
    return h @ params["classifier"]["w"].T + params["classifier"]["b"]


if __name__ == "__main__":
    key = jax.random.PRNGKey(0)

    # maps in the PyTorch module are tensors of shape (in, out); only dims matter:
    # input 16 -> 32 -> 24 -> classifier 2.
    layer_dims = [(16, 32), (32, 24)]
    batch = 8

    key, k_params, k_x = jax.random.split(key, 3)
    params = init_dense_cell_params(k_params, layer_dims, num_classes=2)
    x = jax.random.normal(k_x, (batch, layer_dims[0][0]), jnp.float32)

    prepped = prepare_fused_params(params)          # one-time fold + transpose + pad

    out = dense_cell_forward(prepped, x)
    out = jax.block_until_ready(out)

    ref = dense_cell_reference(params, x)
    assert out.shape == (batch, 2), out.shape
    # bf16 weights => ~0.4% relative rounding on the MXU operands; compare against the
    # full-precision reference with a correspondingly relaxed tolerance.
    assert jnp.allclose(out, ref, atol=3e-2, rtol=3e-2), "mismatch vs reference"

    print("KERNEL_OK")
</pallas_src>

<mosaic_0001>
module attributes {stable_mosaic.version = 11 : i64} {
  func.func @_dense_cell_kernel(%arg0: i32, %arg1: memref<8x16xf32, #tpu.memory_space<vmem>>, %arg2: memref<16x32xbf16, #tpu.memory_space<vmem>>, %arg3: memref<1x32xf32, #tpu.memory_space<vmem>>, %arg4: memref<32x32xbf16, #tpu.memory_space<vmem>>, %arg5: memref<1x32xf32, #tpu.memory_space<vmem>>, %arg6: memref<32x128xbf16, #tpu.memory_space<vmem>>, %arg7: memref<1x128xf32, #tpu.memory_space<vmem>>, %arg8: memref<8x128xf32, #tpu.memory_space<vmem>>) attributes {dimension_semantics = [#tpu.dimension_semantics<parallel>], iteration_bounds = array<i64: 1>, scalar_prefetch = 0 : i64, scratch_operands = 0 : i64, tpu.core_type = #tpu.core_type<tc>, window_params = [{transform_indices = @transform_0, window_bounds = array<i64: 8, 16>}, {pipeline_mode = #tpu.pipeline_mode<synchronous>, transform_indices = @transform_1, window_bounds = array<i64: 16, 32>}, {pipeline_mode = #tpu.pipeline_mode<synchronous>, transform_indices = @transform_2, window_bounds = array<i64: 1, 32>}, {pipeline_mode = #tpu.pipeline_mode<synchronous>, transform_indices = @transform_3, window_bounds = array<i64: 32, 32>}, {pipeline_mode = #tpu.pipeline_mode<synchronous>, transform_indices = @transform_4, window_bounds = array<i64: 1, 32>}, {pipeline_mode = #tpu.pipeline_mode<synchronous>, transform_indices = @transform_5, window_bounds = array<i64: 32, 128>}, {pipeline_mode = #tpu.pipeline_mode<synchronous>, transform_indices = @transform_6, window_bounds = array<i64: 1, 128>}, {transform_indices = @transform_7, window_bounds = array<i64: 8, 128>}]} {
    %c0 = arith.constant 0 : index
    %c0_0 = arith.constant 0 : index
    %0 = vector.load %arg1[%c0, %c0_0] : memref<8x16xf32, #tpu.memory_space<vmem>>, vector<8x16xf32>
    %1 = arith.truncf %0 : vector<8x16xf32> to vector<8x16xbf16>
    %c0_1 = arith.constant 0 : index
    %c0_2 = arith.constant 0 : index
    %2 = vector.load %arg2[%c0_1, %c0_2] : memref<16x32xbf16, #tpu.memory_space<vmem>>, vector<16x32xbf16>
    %cst = arith.constant dense<0.000000e+00> : vector<8x32xf32>
    %3 = tpu.matmul %1, %2, %cst {dimension_numbers = #tpu.dot_dimension_numbers<[1], [0], [0], [1], [0, 0, 1, 1], [], []>} : vector<8x16xbf16>, vector<16x32xbf16>, vector<8x32xf32> -> vector<8x32xf32>
    %c0_3 = arith.constant 0 : index
    %c0_4 = arith.constant 0 : index
    %4 = vector.load %arg3[%c0_3, %c0_4] : memref<1x32xf32, #tpu.memory_space<vmem>>, vector<1x32xf32>
    %5 = vector.broadcast %4 : vector<1x32xf32> to vector<8x32xf32>
    %6 = arith.addf %3, %5 : vector<8x32xf32>
    %cst_5 = arith.constant 0.000000e+00 : f32
    %7 = vector.broadcast %cst_5 : f32 to vector<8x32xf32>
    %8 = arith.maximumf %6, %7 : vector<8x32xf32>
    %9 = arith.truncf %8 : vector<8x32xf32> to vector<8x32xbf16>
    %c0_6 = arith.constant 0 : index
    %c0_7 = arith.constant 0 : index
    %10 = vector.load %arg4[%c0_6, %c0_7] : memref<32x32xbf16, #tpu.memory_space<vmem>>, vector<32x32xbf16>
    %cst_8 = arith.constant dense<0.000000e+00> : vector<8x32xf32>
    %11 = tpu.matmul %9, %10, %cst_8 {dimension_numbers = #tpu.dot_dimension_numbers<[1], [0], [0], [1], [0, 0, 1, 1], [], []>} : vector<8x32xbf16>, vector<32x32xbf16>, vector<8x32xf32> -> vector<8x32xf32>
    %c0_9 = arith.constant 0 : index
    %c0_10 = arith.constant 0 : index
    %12 = vector.load %arg5[%c0_9, %c0_10] : memref<1x32xf32, #tpu.memory_space<vmem>>, vector<1x32xf32>
    %13 = vector.broadcast %12 : vector<1x32xf32> to vector<8x32xf32>
    %14 = arith.addf %11, %13 : vector<8x32xf32>
    %cst_11 = arith.constant 0.000000e+00 : f32
    %15 = vector.broadcast %cst_11 : f32 to vector<8x32xf32>
    %16 = arith.maximumf %14, %15 : vector<8x32xf32>
    %17 = arith.truncf %16 : vector<8x32xf32> to vector<8x32xbf16>
    %c0_12 = arith.constant 0 : index
    %c0_13 = arith.constant 0 : index
    %18 = vector.load %arg6[%c0_12, %c0_13] : memref<32x128xbf16, #tpu.memory_space<vmem>>, vector<32x128xbf16>
    %cst_14 = arith.constant dense<0.000000e+00> : vector<8x128xf32>
    %19 = tpu.matmul %17, %18, %cst_14 {dimension_numbers = #tpu.dot_dimension_numbers<[1], [0], [0], [1], [0, 0, 1, 1], [], []>} : vector<8x32xbf16>, vector<32x128xbf16>, vector<8x128xf32> -> vector<8x128xf32>
    %c0_15 = arith.constant 0 : index
    %c0_16 = arith.constant 0 : index
    %20 = vector.load %arg7[%c0_15, %c0_16] : memref<1x128xf32, #tpu.memory_space<vmem>>, vector<1x128xf32>
    %21 = vector.broadcast %20 : vector<1x128xf32> to vector<8x128xf32>
    %22 = arith.addf %19, %21 : vector<8x128xf32>
    %c0_17 = arith.constant 0 : index
    %c0_18 = arith.constant 0 : index
    %23 = vector.load %arg8[%c0_17, %c0_18] : memref<8x128xf32, #tpu.memory_space<vmem>>, vector<8x128xf32>
    tpu.vector_store %arg8[%c0_17, %c0_18], %22 {strides = array<i32>} : memref<8x128xf32, #tpu.memory_space<vmem>>, vector<8x128xf32>,
    return
  }
  func.func @transform_0(%arg0: i32) -> (i32, i32) {
    %c0_i32 = arith.constant 0 : i32
    %c0_i32_0 = arith.constant 0 : i32
    return %arg0, %c0_i32 : i32, i32
  }
  func.func @transform_1(%arg0: i32) -> (i32, i32) {
    %c0_i32 = arith.constant 0 : i32
    %c0_i32_0 = arith.constant 0 : i32
    %c0_i32_1 = arith.constant 0 : i32
    return %c0_i32, %c0_i32_0 : i32, i32
  }
  func.func @transform_2(%arg0: i32) -> (i32, i32) {
    %c0_i32 = arith.constant 0 : i32
    %c0_i32_0 = arith.constant 0 : i32
    %c0_i32_1 = arith.constant 0 : i32
    return %c0_i32, %c0_i32_0 : i32, i32
  }
  func.func @transform_3(%arg0: i32) -> (i32, i32) {
    %c0_i32 = arith.constant 0 : i32
    %c0_i32_0 = arith.constant 0 : i32
    %c0_i32_1 = arith.constant 0 : i32
    return %c0_i32, %c0_i32_0 : i32, i32
  }
  func.func @transform_4(%arg0: i32) -> (i32, i32) {
    %c0_i32 = arith.constant 0 : i32
    %c0_i32_0 = arith.constant 0 : i32
    %c0_i32_1 = arith.constant 0 : i32
    return %c0_i32, %c0_i32_0 : i32, i32
  }
  func.func @transform_5(%arg0: i32) -> (i32, i32) {
    %c0_i32 = arith.constant 0 : i32
    %c0_i32_0 = arith.constant 0 : i32
    %c0_i32_1 = arith.constant 0 : i32
    return %c0_i32, %c0_i32_0 : i32, i32
  }
  func.func @transform_6(%arg0: i32) -> (i32, i32) {
    %c0_i32 = arith.constant 0 : i32
    %c0_i32_0 = arith.constant 0 : i32
    %c0_i32_1 = arith.constant 0 : i32
    return %c0_i32, %c0_i32_0 : i32, i32
  }
  func.func @transform_7(%arg0: i32) -> (i32, i32) {
    %c0_i32 = arith.constant 0 : i32
    %c0_i32_0 = arith.constant 0 : i32
    return %arg0, %c0_i32 : i32, i32
  }
}

</mosaic_0001>

<bundles_post_ra>
// kernel: tpu_custom_call.1
= control target key start
LH: loop header
LB: loop body
LE: loop exit
PB: predicated region body
PF: predicated region fallthrough
CT: control target
= control target key end

     0   :  { %12 = vsyncpa [#allocation3], 0  ;;  %s454_s0 = inlined_call_operand.hbm [shape: f32[8,16], index: 0, kind: input, shape index: {}]   ;;  %s455_s1 = inlined_call_operand.hbm [shape: bf16[16,32], index: 1, kind: input, shape index: {}]   ;;  %s456_s2 = inlined_call_operand.vmem [shape: f32[1,32], index: 2, kind: input, shape index: {}]   ;;  %s457_s3 = inlined_call_operand.hbm [shape: bf16[32,32], index: 3, kind: input, shape index: {}]   ;;  %s458_s4 = inlined_call_operand.vmem [shape: f32[1,32], index: 4, kind: input, shape index: {}]   ;;  %s459_s5 = inlined_call_operand.hbm [shape: bf16[32,128], index: 5, kind: input, shape index: {}]   ;;  %s460_s6 = inlined_call_operand.vmem [shape: f32[1,128], index: 6, kind: input, shape index: {}]   ;;  %s461_s7 = inlined_call_operand.hbm [shape: f32[8,128], index: 7, kind: output, shape index: {}]  }
   0x1   :  { %13 = vsyncpa [#allocation6], 0 }
   0x2   :  { %14 = vsyncpa [#allocation9], 0  ;;  %s31_s26 = sshll.u32 %s455_s1, 4  ;;  %s32_s26 = int_to_ptr.hbm [resolvable:$true] %s31_s26 }
   0x3   :  { %15 = vsyncpa [#allocation4], 0  ;;  %s383_s27 = smov [#allocation5]   ;;  %s21_s8 = sshll.u32 %s454_s0, 4  ;;  %s22_s8 = int_to_ptr.hbm [resolvable:$true] %s21_s8 }
   0x4   :  { %s33_s28 = sshll.u32 %s383_s27, 4  ;;  %s384_s9 = smov 64   ;;  %s34_s28 = int_to_ptr.vmem [resolvable:$true] %s33_s28 }
   0x5   :  { %s385_s10 = smov 4   ;;  %s386_s11 = smov [#allocation2]  }
   0x6   :  { %39 = dma.hbm_to_vmem [thread:$0]  %s32_s26, 128, %s34_s28, [#allocation6], %s384_s9, %s384_s9, %s385_s10  }
   0x7   :  { %s23_s12 = sshll.u32 %s386_s11, 4  ;;  %s46_s15 = sshll.u32 %s457_s3, 4  ;;  %s24_s12 = int_to_ptr.vmem [resolvable:$true] %s23_s12  ;;  %s47_s15 = int_to_ptr.hbm [resolvable:$true] %s46_s15 }
   0x8   :  { %26 = dma.hbm_to_vmem [thread:$0]  %s22_s8, 128, %s24_s12, [#allocation3]  }
   0x9   :  { %s61_s17 = sshll.u32 %s459_s5, 4  ;;  %s387_s18 = smov [#allocation7]   ;;  %s62_s17 = int_to_ptr.hbm [resolvable:$true] %s61_s17 }
   0xa   :  { %s48_s19 = sshll.u32 %s387_s18, 4  ;;  %s388_s0 = smov [#allocation8]   ;;  %s49_s19 = int_to_ptr.vmem [resolvable:$true] %s48_s19 }
   0xb   :  { %54 = dma.hbm_to_vmem [thread:$0]  %s47_s15, 256, %s49_s19, [#allocation6], %s384_s9, %s384_s9, %s385_s10  }
   0xc   :  { %s63_s20 = sshll.u32 %s388_s0, 4  ;;  %s64_s20 = int_to_ptr.vmem [resolvable:$true] %s63_s20 }
   0xd   :  { %69 = dma.hbm_to_vmem [thread:$0]  %s62_s17, 256, %s64_s20, [#allocation9], %s384_s9, %s384_s9, %s385_s10  }
   0xe   :  { %375 = dma.done.wait [#allocation3], 128  }
   0xf   :  { %376 = vsyncadd [#allocation3], 4294967168 }
  0x10   :  { %377 = dma.done.wait [#allocation6], 384  }
  0x11   :  { %378 = vsyncadd [#allocation6], 4294966912 }
  0x12   :  { %379 = dma.done.wait [#allocation9], 256  }
  0x13   :  { %380 = vsyncadd [#allocation9], 4294967040  ;;  %v240_v0 = vld [vmem:[#allocation5] sm:$0xff]  ;;  %v89_v1 = vld [vmem:[#allocation2] sm:$0xff]  ;;  %vm103_vm0 = vcmask 130048   ;;  %vm142_vm1 = vcmask 261120  }
  0x14   :  { %v90_v2 = vpack.c.bf16 %v89_v1, %v89_v1  ;;  %114 = vmatpush.bf16.msra.mxu0 %v240_v0  ;;  %v242_v3 = vld [vmem:[#allocation7 + $0x8] sm:$0xff]  ;;  %v241_v4 = vld [vmem:[#allocation7] sm:$0xff]  ;;  %v252_v5 = vld [vmem:[%s456_s2] ss:$0 sm:$0xff]  ;;  %s389_s24 = smov [#allocation10]   ;;  %s205_s28 = sshll.u32 %s461_s7, 4  ;;  %s206_s28 = int_to_ptr.hbm [resolvable:$true] %s205_s28 }
  0x15   :  { %152 = vmatpush.bf16.msra.mxu1 %v242_v3  ;;  %v244_v11 = vld [vmem:[#allocation8 + $0x8] sm:$0xff]  ;;  %v243_v12 = vld [vmem:[#allocation8] sm:$0xff]  ;;  %s203_s25 = sshll.u32 %s389_s24, 4  ;;  %s204_s25 = int_to_ptr.vmem [resolvable:$true] %s203_s25 }
  0x16   :  { %190 = vmatpush.bf16.msra.mxu2 %v244_v11  ;;  %v253_v13 = vld [vmem:[%s458_s4] ss:$0 sm:$0xff] }
  0x17   :  { %221 = vmatmul.msk.bf16.vlgmr.msra.gmra.mxu0 %vm103_vm0, %v90_v2  ;;  %v254_v19 = vld [vmem:[%s460_s6] ss:$0 sm:$0xff] }
  0x19   :  { %153 = vmatpush.bf16.msra.mxu1 %v241_v4 }
  0x1a   :  { %191 = vmatpush.bf16.msra.mxu2 %v243_v12 }
  0x94   :  { %v116_v6 = vpop.f32.mrf.mxu0 }
  0x95   :  { %v117_v7 = vadd.f32 %v252_v5, %v116_v6 }
  0x97   :  { %v120_v8 = vmax.f32 %v117_v7, 0.0 }
  0x99   :  { %v121_v9 = vpack.c.bf16 %v120_v8, %v120_v8 }
  0x9b   :  { %230 = vmatmul.msk.bf16.vlgmr.msra.gmra.mxu1 %vm142_vm1, %v121_v9 }
  0x9c   :  { %v118_v10 = vpop.f32.mrf.mxu0 }
 0x118   :  { %v155_v14 = vpop.f32.mrf.mxu1 }
 0x119   :  { %v156_v15 = vadd.f32 %v253_v13, %v155_v14 }
 0x11b   :  { %v159_v16 = vmax.f32 %v156_v15, 0.0 }
 0x11d   :  { %v160_v17 = vpack.c.bf16 %v159_v16, %v159_v16 }
 0x11f   :  { %239 = vmatmul.msk.bf16.vlgmr.msra.gmra.mxu2 %vm142_vm1, %v160_v17 }
 0x120   :  { %v157_v18 = vpop.f32.mrf.mxu1 }
 0x1a2   :  { %v193_v20 = vpop.f32.mrf.mxu2 }
 0x1a3   :  { %v194_v21 = vadd.f32 %v254_v19, %v193_v20 }
 0x1a5   :  { %197 = vst [vmem:[#allocation10] sm:$0xff] %v194_v21 }
 0x1a6   :  { %208 = dma.vmem_to_hbm [thread:$0]  %s204_s25, 128, %s206_s28, [#allocation4]  }
 0x1aa   :  { %v195_v22 = vpop.f32.mrf.mxu2 }
 0x1ab   :  { %381 = dma.done.wait [#allocation4], 128  }
 0x1ac   :  { %382 = vsyncadd [#allocation4], 4294967168 }
 0x1ad   :  { %213 = vsyncpa [#allocation3], 1 }
 0x1ae   :  { %214 = vsyncpa [#allocation6], 1 }
 0x1af   :  { %215 = vsyncpa [#allocation9], 1 }
 0x1b0   :  { %216 = vsyncpa [#allocation4], 1 }

</bundles_post_ra>
